<compile_context>
chip_gen: v7x
topology: tpu7x:2x2x1
jax: 0.10.0
libtpu: 0.0.40
codegen_flags: <defaults>
</compile_context>

<pallas_src>
import jax
import jax.numpy as jnp
from jax.experimental import pallas as pl
from jax.experimental.pallas import tpu as pltpu

_EPS = 1e-12  # torch.nn.functional.normalize default eps


def _l2_normalize_rows(x):
    # x / clamp_min(||x||_2, eps)  ==  x * rsqrt(clamp_min(sumsq, eps^2))
    ss = jnp.sum(x * x, axis=1, keepdims=True)
    return x * jax.lax.rsqrt(jnp.maximum(ss, _EPS * _EPS))


def fusion_mlp_kernel(x_ref, w1_ref, b1_ref, w2_ref, b2_ref, o_ref, xn_ref, acc_ref):
    k = pl.program_id(1)

    @pl.when(k == 0)
    def _init():
        # Hoisted: normalize the input once per batch block, store as bf16 for the MXU.
        x = x_ref[...].astype(jnp.float32)
        xn_ref[...] = _l2_normalize_rows(x).astype(xn_ref.dtype)
        acc_ref[...] = jnp.zeros_like(acc_ref)

    # fc1 tile: (B, tk) = relu(xn @ W1[:, k-tile] + b1[k-tile])   (bf16 x bf16 -> f32)
    feat = jnp.dot(xn_ref[...], w1_ref[...], preferred_element_type=jnp.float32)
    feat = jnp.maximum(feat + b1_ref[...], 0.0)

    # dropout (eval) -> identity; fc2 partial accumulation over the hidden dim.
    acc_ref[...] += jnp.dot(
        feat.astype(w2_ref.dtype), w2_ref[...], preferred_element_type=jnp.float32
    )

    @pl.when(k == pl.num_programs(1) - 1)
    def _finalize():
        hid = acc_ref[...] + b2_ref[...]
        out = jnp.tanh(hid)  # alpha == 1.0
        o_ref[...] = _l2_normalize_rows(out).astype(o_ref.dtype)


def fusion_mlp_forward(x, w1, b1, w2, b2, *, tk=512):
    B, din = x.shape
    hidden = w1.shape[1]
    out_dim = w2.shape[1]
    assert w1.shape[0] == din and w2.shape[0] == hidden

    # Lane-dense output: pad fc2 output dim to a multiple of 128 with zeros
    # (zeros -> tanh(0)=0 -> no effect on the row L2 norm), slice after the call.
    out_pad = max(128, ((out_dim + 127) // 128) * 128)
    if out_pad != out_dim:
        w2 = jnp.pad(w2, ((0, 0), (0, out_pad - out_dim)))
        b2 = jnp.pad(b2, ((0, 0), (0, out_pad - out_dim)))

    # Hidden-dim tile: multiple of 128 that divides `hidden` (4096 in this module).
    while tk > 128 and hidden % tk != 0:
        tk //= 2
    assert hidden % tk == 0 and tk % 128 == 0

    # Batch tile: split only when the blocks stay (8, *)-aligned -> megacore on v7x.
    bm = B // 2 if (B % 16 == 0) else B

    grid = (B // bm, hidden // tk)

    itemsize = lambda a: a.dtype.itemsize
    cost = pl.CostEstimate(
        flops=2 * B * din * hidden + 2 * B * hidden * out_pad,
        transcendentals=B * out_pad + 2 * B,  # tanh + two rsqrts per row
        bytes_accessed=(
            x.size * itemsize(x)
            + w1.size * itemsize(w1)
            + w2.size * itemsize(w2)
            + b1.size * itemsize(b1)
            + b2.size * itemsize(b2)
            + B * out_pad * 4
        ),
    )

    out = pl.pallas_call(
        fusion_mlp_kernel,
        out_shape=jax.ShapeDtypeStruct((B, out_pad), jnp.float32),
        grid_spec=pltpu.PrefetchScalarGridSpec(
            num_scalar_prefetch=0,
            grid=grid,
            in_specs=[
                pl.BlockSpec((bm, din), lambda b, k: (b, 0)),      # x
                pl.BlockSpec((din, tk), lambda b, k: (0, k)),      # W1 column tile
                pl.BlockSpec((1, tk), lambda b, k: (0, k)),        # b1 tile
                pl.BlockSpec((tk, out_pad), lambda b, k: (k, 0)),  # W2 row tile
                pl.BlockSpec((1, out_pad), lambda b, k: (0, 0)),   # b2
            ],
            out_specs=pl.BlockSpec((bm, out_pad), lambda b, k: (b, 0)),
            scratch_shapes=[
                pltpu.VMEM((bm, din), jnp.bfloat16),   # normalized input (hoisted)
                pltpu.VMEM((bm, out_pad), jnp.float32),  # fc2 accumulator
            ],
        ),
        compiler_params=pltpu.CompilerParams(
            dimension_semantics=("parallel", "arbitrary"),
            vmem_limit_bytes=32 << 20,
        ),
        cost_estimate=cost,
    )(x, w1, b1, w2, b2)

    return out[:, :out_dim] if out_pad != out_dim else out


def make_params(key, input_dim, out_put, hidden=4096):
    # Shapes per FusionMlp.__init__: fc1 = Linear(input_dim, 4096), tohash = Linear(4096, out_put).
    # Weights stored pre-transposed (in, out); streamed to the kernel in bf16, biases in f32.
    k1, k2, k3, k4 = jax.random.split(key, 4)
    bound1 = 1.0 / (input_dim ** 0.5)
    bound2 = 1.0 / (hidden ** 0.5)
    w1 = jax.random.uniform(k1, (input_dim, hidden), jnp.float32, -bound1, bound1)
    b1 = jax.random.uniform(k2, (1, hidden), jnp.float32, -bound1, bound1)
    w2 = jax.random.uniform(k3, (hidden, out_put), jnp.float32, -bound2, bound2)
    b2 = jax.random.uniform(k4, (1, out_put), jnp.float32, -bound2, bound2)
    return w1.astype(jnp.bfloat16), b1, w2.astype(jnp.bfloat16), b2


def reference_forward(x, w1, b1, w2, b2):
    # Pure-JAX reference matching the kernel's mixed-precision path
    # (bf16 weights / bf16 activations into the MXU, f32 accumulation).
    xn = _l2_normalize_rows(x.astype(jnp.float32))
    xb = xn.astype(jnp.bfloat16).astype(jnp.float32)
    feat = jnp.maximum(xb @ w1.astype(jnp.float32) + b1, 0.0)
    fb = feat.astype(jnp.bfloat16).astype(jnp.float32)
    hid = fb @ w2.astype(jnp.float32) + b2
    out = jnp.tanh(hid)
    return _l2_normalize_rows(out)


if __name__ == "__main__":
    key = jax.random.PRNGKey(0)
    kx, kp = jax.random.split(key)

    B, input_dim, out_put = 8, 256, 128  # small, TPU-friendly shapes
    x = jax.random.normal(kx, (B, input_dim), jnp.float32)
    w1, b1, w2, b2 = make_params(kp, input_dim, out_put)

    out = fusion_mlp_forward(x, w1, b1, w2, b2)
    out = jax.block_until_ready(out)

    ref = reference_forward(x, w1, b1, w2, b2)
    assert out.shape == (B, out_put)
    assert jnp.allclose(out, ref, atol=5e-4, rtol=5e-3), "mismatch vs reference"

    print("KERNEL_OK")
</pallas_src>

<mosaic_0001>
module attributes {stable_mosaic.version = 11 : i64} {
  func.func @fusion_mlp_kernel(%arg0: i32, %arg1: i32, %arg2: memref<8x256xf32, #tpu.memory_space<vmem>>, %arg3: memref<256x512xbf16, #tpu.memory_space<vmem>>, %arg4: memref<1x512xf32, #tpu.memory_space<vmem>>, %arg5: memref<512x128xbf16, #tpu.memory_space<vmem>>, %arg6: memref<1x128xf32, #tpu.memory_space<vmem>>, %arg7: memref<8x128xf32, #tpu.memory_space<vmem>>, %arg8: memref<8x256xbf16, #tpu.memory_space<vmem>>, %arg9: memref<8x128xf32, #tpu.memory_space<vmem>>) attributes {dimension_semantics = [#tpu.dimension_semantics<parallel>, #tpu.dimension_semantics<arbitrary>], iteration_bounds = array<i64: 1, 8>, scalar_prefetch = 0 : i64, scratch_operands = 2 : i64, tpu.core_type = #tpu.core_type<tc>, window_params = [{transform_indices = @transform_0, window_bounds = array<i64: 8, 256>}, {transform_indices = @transform_1, window_bounds = array<i64: 256, 512>}, {transform_indices = @transform_2, window_bounds = array<i64: 1, 512>}, {transform_indices = @transform_3, window_bounds = array<i64: 512, 128>}, {pipeline_mode = #tpu.pipeline_mode<synchronous>, transform_indices = @transform_4, window_bounds = array<i64: 1, 128>}, {transform_indices = @transform_5, window_bounds = array<i64: 8, 128>}]} {
    %c0_i32 = arith.constant 0 : i32
    %0 = arith.cmpi eq, %arg1, %c0_i32 : i32
    %1 = arith.extui %0 : i1 to i32
    %c0_i32_0 = arith.constant 0 : i32
    %2 = arith.cmpi ne, %1, %c0_i32_0 : i32
    scf.if %2 {
      %c0_15 = arith.constant 0 : index
      %c0_16 = arith.constant 0 : index
      %20 = vector.load %arg2[%c0_15, %c0_16] : memref<8x256xf32, #tpu.memory_space<vmem>>, vector<8x256xf32>
      %21 = arith.mulf %20, %20 : vector<8x256xf32>
      %cst_17 = arith.constant dense<0.000000e+00> : vector<8xf32>
      %22 = vector.multi_reduction <add>, %21, %cst_17 [1] : vector<8x256xf32> to vector<8xf32>
      %23 = vector.shape_cast %22 : vector<8xf32> to vector<8x1xf32>
      %cst_18 = arith.constant 1.000000e-24 : f32
      %24 = vector.broadcast %cst_18 : f32 to vector<8x1xf32>
      %25 = arith.maximumf %23, %24 : vector<8x1xf32>
      %26 = math.rsqrt %25 : vector<8x1xf32>
      %27 = vector.broadcast %26 : vector<8x1xf32> to vector<8x256xf32>
      %28 = arith.mulf %20, %27 : vector<8x256xf32>
      %29 = arith.truncf %28 : vector<8x256xf32> to vector<8x256xbf16>
      %c0_19 = arith.constant 0 : index
      %c0_20 = arith.constant 0 : index
      %30 = vector.load %arg8[%c0_19, %c0_20] : memref<8x256xbf16, #tpu.memory_space<vmem>>, vector<8x256xbf16>
      tpu.vector_store %arg8[%c0_19, %c0_20], %29 {strides = array<i32>} : memref<8x256xbf16, #tpu.memory_space<vmem>>, vector<8x256xbf16>,
      %cst_21 = arith.constant 0.000000e+00 : f32
      %31 = vector.broadcast %cst_21 : f32 to vector<8x128xf32>
      %c0_22 = arith.constant 0 : index
      %c0_23 = arith.constant 0 : index
      %32 = vector.load %arg9[%c0_22, %c0_23] : memref<8x128xf32, #tpu.memory_space<vmem>>, vector<8x128xf32>
      tpu.vector_store %arg9[%c0_22, %c0_23], %31 {strides = array<i32>} : memref<8x128xf32, #tpu.memory_space<vmem>>, vector<8x128xf32>,
    } else {
    }
    %c0 = arith.constant 0 : index
    %c0_1 = arith.constant 0 : index
    %3 = vector.load %arg8[%c0, %c0_1] : memref<8x256xbf16, #tpu.memory_space<vmem>>, vector<8x256xbf16>
    %c0_2 = arith.constant 0 : index
    %c0_3 = arith.constant 0 : index
    %4 = vector.load %arg3[%c0_2, %c0_3] : memref<256x512xbf16, #tpu.memory_space<vmem>>, vector<256x512xbf16>
    %cst = arith.constant dense<0.000000e+00> : vector<8x512xf32>
    %5 = tpu.matmul %3, %4, %cst {dimension_numbers = #tpu.dot_dimension_numbers<[1], [0], [0], [1], [0, 0, 1, 1], [], []>} : vector<8x256xbf16>, vector<256x512xbf16>, vector<8x512xf32> -> vector<8x512xf32>
    %c0_4 = arith.constant 0 : index
    %c0_5 = arith.constant 0 : index
    %6 = vector.load %arg4[%c0_4, %c0_5] : memref<1x512xf32, #tpu.memory_space<vmem>>, vector<1x512xf32>
    %7 = vector.broadcast %6 : vector<1x512xf32> to vector<8x512xf32>
    %8 = arith.addf %5, %7 : vector<8x512xf32>
    %cst_6 = arith.constant 0.000000e+00 : f32
    %9 = vector.broadcast %cst_6 : f32 to vector<8x512xf32>
    %10 = arith.maximumf %8, %9 : vector<8x512xf32>
    %c0_7 = arith.constant 0 : index
    %c0_8 = arith.constant 0 : index
    %11 = vector.load %arg9[%c0_7, %c0_8] : memref<8x128xf32, #tpu.memory_space<vmem>>, vector<8x128xf32>
    %12 = arith.truncf %10 : vector<8x512xf32> to vector<8x512xbf16>
    %c0_9 = arith.constant 0 : index
    %c0_10 = arith.constant 0 : index
    %13 = vector.load %arg5[%c0_9, %c0_10] : memref<512x128xbf16, #tpu.memory_space<vmem>>, vector<512x128xbf16>
    %cst_11 = arith.constant dense<0.000000e+00> : vector<8x128xf32>
    %14 = tpu.matmul %12, %13, %cst_11 {dimension_numbers = #tpu.dot_dimension_numbers<[1], [0], [0], [1], [0, 0, 1, 1], [], []>} : vector<8x512xbf16>, vector<512x128xbf16>, vector<8x128xf32> -> vector<8x128xf32>
    %15 = arith.addf %11, %14 : vector<8x128xf32>
    %c0_12 = arith.constant 0 : index
    %c0_13 = arith.constant 0 : index
    %16 = vector.load %arg9[%c0_12, %c0_13] : memref<8x128xf32, #tpu.memory_space<vmem>>, vector<8x128xf32>
    tpu.vector_store %arg9[%c0_12, %c0_13], %15 {strides = array<i32>} : memref<8x128xf32, #tpu.memory_space<vmem>>, vector<8x128xf32>,
    %c7_i32 = arith.constant 7 : i32
    %17 = arith.cmpi eq, %arg1, %c7_i32 : i32
    %18 = arith.extui %17 : i1 to i32
    %c0_i32_14 = arith.constant 0 : i32
    %19 = arith.cmpi ne, %18, %c0_i32_14 : i32
    scf.if %19 {
      %c0_15 = arith.constant 0 : index
      %c0_16 = arith.constant 0 : index
      %20 = vector.load %arg9[%c0_15, %c0_16] : memref<8x128xf32, #tpu.memory_space<vmem>>, vector<8x128xf32>
      %c0_17 = arith.constant 0 : index
      %c0_18 = arith.constant 0 : index
      %21 = vector.load %arg6[%c0_17, %c0_18] : memref<1x128xf32, #tpu.memory_space<vmem>>, vector<1x128xf32>
      %22 = vector.broadcast %21 : vector<1x128xf32> to vector<8x128xf32>
      %23 = arith.addf %20, %22 : vector<8x128xf32>
      %24 = math.tanh %23 : vector<8x128xf32>
      %25 = arith.mulf %24, %24 : vector<8x128xf32>
      %cst_19 = arith.constant dense<0.000000e+00> : vector<8xf32>
      %26 = vector.multi_reduction <add>, %25, %cst_19 [1] : vector<8x128xf32> to vector<8xf32>
      %27 = vector.shape_cast %26 : vector<8xf32> to vector<8x1xf32>
      %cst_20 = arith.constant 1.000000e-24 : f32
      %28 = vector.broadcast %cst_20 : f32 to vector<8x1xf32>
      %29 = arith.maximumf %27, %28 : vector<8x1xf32>
      %30 = math.rsqrt %29 : vector<8x1xf32>
      %31 = vector.broadcast %30 : vector<8x1xf32> to vector<8x128xf32>
      %32 = arith.mulf %24, %31 : vector<8x128xf32>
      %c0_21 = arith.constant 0 : index
      %c0_22 = arith.constant 0 : index
      %33 = vector.load %arg7[%c0_21, %c0_22] : memref<8x128xf32, #tpu.memory_space<vmem>>, vector<8x128xf32>
      tpu.vector_store %arg7[%c0_21, %c0_22], %32 {strides = array<i32>} : memref<8x128xf32, #tpu.memory_space<vmem>>, vector<8x128xf32>,
    } else {
    }
    return
  }
  func.func @transform_0(%arg0: i32, %arg1: i32) -> (i32, i32) {
    %c0_i32 = arith.constant 0 : i32
    %c0_i32_0 = arith.constant 0 : i32
    return %arg0, %c0_i32 : i32, i32
  }
  func.func @transform_1(%arg0: i32, %arg1: i32) -> (i32, i32) {
    %c0_i32 = arith.constant 0 : i32
    %c0_i32_0 = arith.constant 0 : i32
    return %c0_i32, %arg1 : i32, i32
  }
  func.func @transform_2(%arg0: i32, %arg1: i32) -> (i32, i32) {
    %c0_i32 = arith.constant 0 : i32
    %c0_i32_0 = arith.constant 0 : i32
    return %c0_i32, %arg1 : i32, i32
  }
  func.func @transform_3(%arg0: i32, %arg1: i32) -> (i32, i32) {
    %c0_i32 = arith.constant 0 : i32
    %c0_i32_0 = arith.constant 0 : i32
    return %arg1, %c0_i32 : i32, i32
  }
  func.func @transform_4(%arg0: i32, %arg1: i32) -> (i32, i32) {
    %c0_i32 = arith.constant 0 : i32
    %c0_i32_0 = arith.constant 0 : i32
    %c0_i32_1 = arith.constant 0 : i32
    return %c0_i32, %c0_i32_0 : i32, i32
  }
  func.func @transform_5(%arg0: i32, %arg1: i32) -> (i32, i32) {
    %c0_i32 = arith.constant 0 : i32
    %c0_i32_0 = arith.constant 0 : i32
    return %arg0, %c0_i32 : i32, i32
  }
}

</mosaic_0001>

<bundles_post_ra>
// kernel: tpu_custom_call.1
= control target key start
LH: loop header
LB: loop body
LE: loop exit
PB: predicated region body
PF: predicated region fallthrough
CT: control target
= control target key end

     0   :  { %s2461_s0 = inlined_call_operand.hbm [shape: f32[8,256], index: 0, kind: input, shape index: {}]   ;;  %s2462_s1 = inlined_call_operand.hbm [shape: bf16[256,4096], index: 1, kind: input, shape index: {}]   ;;  %s2463_s2 = inlined_call_operand.hbm [shape: f32[1,4096], index: 2, kind: input, shape index: {}]   ;;  %s2464_s3 = inlined_call_operand.hbm [shape: bf16[4096,128], index: 3, kind: input, shape index: {}]   ;;  %s2465_s4 = inlined_call_operand.hbm [shape: f32[1,128], index: 4, kind: input, shape index: {}]   ;;  %s2466_s5 = inlined_call_operand.hbm [shape: f32[8,128], index: 5, kind: output, shape index: {}]  }
   0x1   :  { %2480 = sst [smem:[#allocation22_spill]] %s2462_s1 }
   0x2   :  { %2481 = sst [smem:[#allocation23_spill]] %s2465_s4 }
   0x3   :  { %10 = vsyncpa [#allocation5], 0 }
   0x4   :  { %11 = vsyncpa [#allocation8], 0 }
   0x5   :  { %13 = vsyncpa [#allocation8 + $0x1], 0 }
   0x6   :  { %14 = vsyncpa [#allocation11], 0 }
   0x7   :  { %16 = vsyncpa [#allocation11 + $0x1], 0 }
   0x8   :  { %17 = vsyncpa [#allocation6], 0  ;;  %s2076_s18 = smov 0   ;;  %s2078_s19 = smov 0  }
   0x9   :  { %s2080_s20 = smov 0   ;;  %s2082_s21 = smov 0  }
   0xa   :  { %s2084_s22 = smov 0   ;;  %s2086_s23 = smov 0  }
   0xb LB: > { %2482 = sst [smem:[#allocation19_spill]] %s2020_s20  ;;  %s2105_s24 = sadd.s32 4294967295, %s2032_s23   ;;  %s2032_s23 = sphi %s2086_s23, %s23_s23   ;;  %s2028_s22 = sphi %s2084_s22, %s2511_s22   ;;  %s2024_s21 = sphi %s2082_s21, %s2510_s21   ;;  %s2020_s20 = sphi %s2080_s20, %s2506_s20   ;;  %s2016_s19 = sphi %s2078_s19, %s2509_s19   ;;  %s2012_s18 = sphi %s2076_s18, %s2508_s18  }
   0xc   : > { %s68_s25 = sadd.s32 1, %s2020_s20  ;;  %p75_p0 = scmp.ne.s32.totalorder %s2020_s20, %s2016_s19 }
   0xd   : > { %p76_p1 = scmp.eq.s32.totalorder %s2032_s23, 0  ;;  %p81_p2 = scmp.ne.s32.totalorder %s2016_s19, %s2012_s18 }
   0xe   : > { %p2467_p3 = scmp.eq.s32.totalorder %s2105_s24, 0  ;;  %p1386_p5 = scmp.ge.s32.totalorder %s2032_s23, 1 }
   0xf   : > { %p77_p4 = por %p76_p1, %p75_p0  ;;  %p191_p7 = scmp.lt.s32.totalorder %s2032_s23, 9 }
  0x10   : > { %p2116_p6 = por %p2467_p3, %p81_p2  ;;  %s2034_s28 = smov [#allocation12]  }
  0x11   : > { %p2121_p8 = pnand %p1386_p5, %p191_p7  ;;  %s218_s29 = sshll.u32 %s2034_s28, 4  ;;  %s219_s29 = int_to_ptr.vmem [resolvable:$true] %s218_s29 }
  0x12   : > { %s2483_s26 = scalar_select %p2116_p6, 1, 0 }
  0x13   : > { %s2484_s27 = scalar_select %p2121_p8, 1, 0 }
  0x14   : > { %p1577_p9 = pneg %p2121_p8  ;;  %p1596_p10 = scmp.lt.s32.totalorder %s2032_s23, 8 }
  0x15   : > { %s2474_s30 = sand.u32 1, %s2032_s23   ;;  %s2487_s4 = sld [smem:[#allocation23_spill]] }
  0x16   : > { %p2131_p11 = pnand %p1577_p9, %p2467_p3  ;;  %p2135_p12 = pnand %p1596_p10, %p77_p4 }
  0x18   : > { %s2485_s6 = scalar_select %p2131_p11, 1, 0 }
  0x19   : > { %s2486_s7 = scalar_select %p2135_p12, 1, 0 }
  0x1a   : > { %p2471_p0 = pneg %p2131_p11 }
  0x1b   : > { %s1794_s10 = scalar_lea.hbm %s2487_s4, 16 }
  0x1c   : > { %p1795_p13 = scmp.ne.s32.totalorder %s2487_s4, %s1794_s10  ;;  %p1801_p4 = scmp.lt.u32.totalorder %s1794_s10, %s2487_s4 }
  0x1e   : > { %p1797_p1 = pnand %p2471_p0, %p1795_p13 }
  0x20   : > { %p1798_p2 = pneg %p1797_p1 }
  0x22   : > { %p1803_p5 = pnand %p1801_p4, %p1798_p2 }
  0x24   : > { %1806 = shalt.err (!%p1803_p5)
}
  0x25   : > { %s1807_s15 = scalar_lea.vmem %s219_s29, 16  ;;  %s1814_s16 = scalar_lea.vmem %s219_s29, 32 }
  0x26   : > { %p1808_p7 = scmp.ne.s32.totalorder %s219_s29, %s1807_s15  ;;  %p1815_p3 = scmp.lt.s32.totalorder %s219_s29, %s219_s29 }
  0x27   : > { %p1816_p6 = scmp.lt.s32.totalorder %s1814_s16, %s1807_s15 }
  0x28   : > { %p1810_p9 = pnand %p1808_p7, %p2471_p0 }
  0x29   : > { %p1817_p8 = por %p1816_p6, %p1815_p3 }
  0x2a   : > { %p1811_p10 = pneg %p1810_p9 }
  0x2c   : > { %p1818_p12 = pnand %p1817_p8, %p1811_p10 }
  0x2e   : > { %1821 = shalt.err (!%p1818_p12)
}
  0x2f   : > { %1583 = dma.hbm_to_vmem [thread:$0]  (!%p2131_p11), %s2487_s4, 16, %s219_s29, [#allocation11]  }
  0x30   : > { %s32_s28 = sadd.s32 1, %s2028_s22  ;;  %s2163_s8 = sand.u32 1, %s2020_s20  }
  0x31   : > { %p33_p3 = scmp.ge.s32.totalorder %s32_s28, 8  ;;  %s1390_s9 = sshll.u32 %s2163_s8, 9 }
  0x32   : > { %s1511_s10 = sshll.u32 %s2028_s22, 8  ;;  %s2489_s1 = sld [smem:[#allocation22_spill]] }
  0x33   : > { %s2513_s28 = smov (%p33_p3, %s32_s28), 0  ;;  %s233_s29 = scalar_lea.vmem [#allocation7], %s1390_s9 }
  0x34   : > { %2488 = sst [smem:[#allocation20_spill]] %s2513_s28  ;;  %s240_s14 = sshll.u32 %s233_s29, 4  ;;  %s2176_s14 = int_to_ptr.vmem [resolvable:$true] %s240_s14 }
  0x35   : > { %s65_s15 = ssub.s32 %s2028_s22, %s2513_s28  ;;  %s2185_s17 = scalar_lea.sflag [#allocation8], %s2474_s30 }
  0x36   : > { %p66_p6 = scmp.eq.s32.totalorder %s65_s15, 0  ;;  %p2491_p12 = scmp.ne.s32.totalorder %s2486_s7, 0 }
  0x38   : > { %s2172_s13 = scalar_lea.hbm %s2489_s1, %s1511_s10  ;;  %p2191_p13 = pneg %p2491_p12 }
  0x39   : > { %s2181_s16 = scalar_select %p66_p6, %s2020_s20, %s68_s25  }
  0x3a   : > { %s1822_s18 = scalar_lea.hbm %s2172_s13, 8192  ;;  %s1827_s12 = scalar_lea.hbm %s2489_s1, 65536 }
  0x3b   : > { %2490 = sst [smem:[#allocation21_spill]] %s2181_s16  ;;  %p1823_p8 = scmp.ne.s32.totalorder %s2172_s13, %s1822_s18 }
  0x3c   : > { %s2492_s10 = scalar_select %p2191_p13, 1, 0 }
  0x3d   : > { %p1825_p1 = pnand %p2191_p13, %p1823_p8  ;;  %p1828_p4 = scmp.lt.u32.totalorder %s2172_s13, %s2489_s1 }
  0x3e   : > { %p1829_p5 = scmp.lt.u32.totalorder %s1827_s12, %s1822_s18  ;;  %p1831_p9 = scmp.lt.u32.totalorder %s1822_s18, %s2172_s13 }
  0x3f   : > { %p1826_p2 = pneg %p1825_p1 }
  0x40   : > { %p1830_p7 = por %p1829_p5, %p1828_p4 }
  0x42   : > { %p1832_p10 = por %p1831_p9, %p1830_p7 }
  0x44   : > { %p1833_p3 = pnand %p1832_p10, %p1826_p2 }
  0x46   : > { %1836 = shalt.err (!%p1833_p3)
}
  0x47   : > { %s1837_s15 = scalar_lea.vmem %s2176_s14, 8192  ;;  %s2035_s9 = smov [#allocation7]  }
  0x48   : > { %p1838_p6 = scmp.ne.s32.totalorder %s2176_s14, %s1837_s15  ;;  %s1842_s11 = sshll.u32 %s2035_s9, 4  ;;  %s1843_s11 = int_to_ptr.vmem [resolvable:$false] %s1842_s11 }
  0x49   : > { %s1844_s25 = scalar_lea.vmem %s1843_s11, 16384  ;;  %p1845_p0 = scmp.lt.s32.totalorder %s2176_s14, %s1843_s11 }
  0x4a   : > { %p1840_p8 = pnand %p1838_p6, %p2191_p13  ;;  %p1846_p11 = scmp.lt.s32.totalorder %s1844_s25, %s1837_s15 }
  0x4c   : > { %p1841_p1 = pneg %p1840_p8  ;;  %p1847_p4 = por %p1846_p11, %p1845_p0 }
  0x4e   : > { %p1848_p5 = pnand %p1847_p4, %p1841_p1 }
  0x50   : > { %1851 = shalt.err (!%p1848_p5)
}
  0x51   : > { %s2036_s18 = smov 2048   ;;  %s2037_s12 = smov 256  }
  0x52   : > { %s2038_s29 = smov 16   ;;  %s2039_s30 = smov [#allocation4]  }
  0x53   : > { %1587 = dma.hbm_to_vmem [thread:$0]  (!%p2491_p12), %s2172_s13, 8192, %s2176_s14, %s2185_s17, %s2036_s18, %s2037_s12, %s2038_s29  }
  0x54   : > { %s207_s9 = sshll.u32 %s2039_s30, 4  ;;  %s1393_s1 = sshll.u32 %s2163_s8, 2  ;;  %s208_s9 = int_to_ptr.vmem [resolvable:$true] %s207_s9 }
  0x55   : > { %s1852_s25 = scalar_lea.hbm %s2461_s0, 256  ;;  %p2493_p0 = scmp.ne.s32.totalorder %s2485_s6, 0 }
  0x56   : > { %p1853_p11 = scmp.ne.s32.totalorder %s2461_s0, %s1852_s25  ;;  %p1859_p10 = scmp.lt.u32.totalorder %s1852_s25, %s2461_s0 }
  0x57   : > { %p2494_p2 = pneg %p2493_p0 }
  0x59   : > { %p1855_p7 = pnand %p1853_p11, %p2494_p2 }
  0x5b   : > { %p1856_p9 = pneg %p1855_p7 }
  0x5d   : > { %p1861_p3 = pnand %p1859_p10, %p1856_p9 }
  0x5f   : > { %1864 = shalt.err (!%p1861_p3)
}
  0x60   : > { %s1865_s30 = scalar_lea.vmem %s208_s9, 256  ;;  %p2495_p8 = pmov %p2494_p2 }
  0x61   : > { %p1866_p6 = scmp.ne.s32.totalorder %s208_s9, %s1865_s30  ;;  %p1873_p5 = scmp.lt.s32.totalorder %s208_s9, %s208_s9 }
  0x62   : > { %p1874_p12 = scmp.lt.s32.totalorder %s1865_s30, %s1865_s30 }
  0x63   : > { %p1868_p1 = pnand %p1866_p6, %p2495_p8 }
  0x64   : > { %p1875_p13 = por %p1874_p12, %p1873_p5 }
  0x65   : > { %p1869_p4 = pneg %p1868_p1 }
  0x67   : > { %p1876_p2 = pnand %p1875_p13, %p1869_p4 }
  0x69   : > { %1879 = shalt.err (!%p1876_p2)
}
  0x6a   : > { %1580 = dma.hbm_to_vmem [thread:$0]  (!%p2493_p0), %s2461_s0, 256, %s208_s9, [#allocation5]  }
  0x6b   : > { %s1512_s20 = sshll.u32 %s2028_s22, 6  ;;  %s254_s18 = scalar_lea.vmem [#allocation9], %s1393_s1 }
  0x6c   : > { %s2240_s16 = scalar_lea.hbm %s2463_s2, %s1512_s20  ;;  %s262_s12 = sshll.u32 %s254_s18, 4  ;;  %s263_s12 = int_to_ptr.vmem [resolvable:$true] %s262_s12 }
  0x6d   : > { %s1880_s6 = scalar_lea.hbm %s2240_s16, 64  ;;  %p2496_p13 = scmp.ne.s32.totalorder %s2492_s10, 0 }
  0x6e   : > { %p1881_p12 = scmp.ne.s32.totalorder %s2240_s16, %s1880_s6  ;;  %s1885_s11 = scalar_lea.hbm %s2463_s2, 512 }
  0x6f   : > { %p1886_p0 = scmp.lt.u32.totalorder %s2240_s16, %s2463_s2  ;;  %p1887_p9 = scmp.lt.u32.totalorder %s1885_s11, %s1880_s6 }
  0x70   : > { %p1883_p11 = pnand %p1881_p12, %p2496_p13  ;;  %p1889_p3 = scmp.lt.u32.totalorder %s1880_s6, %s2240_s16 }
  0x71   : > { %p1888_p10 = por %p1887_p9, %p1886_p0 }
  0x72   : > { %p1884_p7 = pneg %p1883_p11 }
  0x73   : > { %p1890_p6 = por %p1889_p3, %p1888_p10 }
  0x75   : > { %p1891_p8 = pnand %p1890_p6, %p1884_p7 }
  0x77   : > { %1894 = shalt.err (!%p1891_p8)
}
  0x78   : > { %s1895_s1 = scalar_lea.vmem %s263_s12, 64  ;;  %s2040_s30 = smov [#allocation9]  }
  0x79   : > { %p1896_p1 = scmp.ne.s32.totalorder %s263_s12, %s1895_s1  ;;  %s1900_s4 = sshll.u32 %s2040_s30, 4  ;;  %s1901_s4 = int_to_ptr.vmem [resolvable:$false] %s1900_s4 }
  0x7a   : > { %s1902_s28 = scalar_lea.vmem %s1901_s4, 128  ;;  %p1903_p2 = scmp.lt.s32.totalorder %s263_s12, %s1901_s4 }
  0x7b   : > { %p1898_p4 = pnand %p1896_p1, %p2496_p13  ;;  %p1904_p12 = scmp.lt.s32.totalorder %s1902_s28, %s1895_s1 }
  0x7d   : > { %p1899_p5 = pneg %p1898_p4  ;;  %p1905_p11 = por %p1904_p12, %p1903_p2 }
  0x7f   : > { %p1906_p0 = pnand %p1905_p11, %p1899_p5 }
  0x81   : > { %1909 = shalt.err (!%p1906_p0)
}
  0x82   : > { %p2497_p9 = scmp.ne.s32.totalorder %s2486_s7, 0  ;;  %s1396_s20 = sshll.u32 %s2163_s8, 8 }
  0x83   : > { %s1513_s13 = sshll.u32 %s2028_s22, 12  ;;  %s273_s29 = scalar_lea.vmem [#allocation10], %s1396_s20 }
  0x84   : > { %1590 = dma.hbm_to_vmem [thread:$0]  (!%p2497_p9), %s2240_s16, 64, %s263_s12, %s2185_s17  }
  0x85   : > { %s2265_s6 = scalar_lea.hbm %s2464_s3, %s1513_s13  ;;  %s280_s9 = sshll.u32 %s273_s29, 4  ;;  %s2267_s9 = int_to_ptr.vmem [resolvable:$true] %s280_s9 }
  0x86   : > { %s2498_s11 = sand.u32 1, %s2032_s23   ;;  %s1910_s25 = scalar_lea.hbm %s2265_s6, 4096 }
  0x87   : > { %s2271_s15 = scalar_lea.sflag [#allocation11], %s2498_s11  ;;  %p1911_p7 = scmp.ne.s32.totalorder %s2265_s6, %s1910_s25 }
  0x88   : > { %s1915_s16 = scalar_lea.hbm %s2464_s3, 32768  ;;  %p1916_p6 = scmp.lt.u32.totalorder %s2265_s6, %s2464_s3 }
  0x89   : > { %p1913_p10 = pnand %p1911_p7, %p2496_p13  ;;  %p1917_p8 = scmp.lt.u32.totalorder %s1915_s16, %s1910_s25 }
  0x8a   : > { %p1919_p4 = scmp.lt.u32.totalorder %s1910_s25, %s2265_s6 }
  0x8b   : > { %p1914_p3 = pneg %p1913_p10  ;;  %p1918_p1 = por %p1917_p8, %p1916_p6 }
  0x8d   : > { %p1920_p5 = por %p1919_p4, %p1918_p1 }
  0x8f   : > { %p1921_p2 = pnand %p1920_p5, %p1914_p3 }
  0x91   : > { %1924 = shalt.err (!%p1921_p2)
}
  0x92   : > { %s1925_s30 = scalar_lea.vmem %s2267_s9, 4096  ;;  %s2041_s4 = smov [#allocation10]  }
  0x93   : > { %p1926_p12 = scmp.ne.s32.totalorder %s2267_s9, %s1925_s30  ;;  %s1930_s28 = sshll.u32 %s2041_s4, 4  ;;  %s1931_s28 = int_to_ptr.vmem [resolvable:$false] %s1930_s28 }
  0x94   : > { %s1932_s20 = scalar_lea.vmem %s1931_s28, 8192  ;;  %p1933_p7 = scmp.lt.s32.totalorder %s2267_s9, %s1931_s28 }
  0x95   : > { %p1928_p11 = pnand %p1926_p12, %p2496_p13  ;;  %p1934_p10 = scmp.lt.s32.totalorder %s1932_s20, %s1925_s30 }
  0x97   : > { %p1929_p0 = pneg %p1928_p11  ;;  %p1935_p6 = por %p1934_p10, %p1933_p7 }
  0x99   : > { %p1936_p8 = pnand %p1935_p6, %p1929_p0 }
  0x9b   : > { %1939 = shalt.err (!%p1936_p8)
}
  0x9c   : > { %s2042_s13 = smov 64   ;;  %s2043_s14 = smov 4  }
  0x9d   : > { %1593 = dma.hbm_to_vmem [thread:$0]  (!%p2497_p9), %s2265_s6, 4096, %s2267_s9, %s2271_s15, %s2042_s13, %s2042_s13, %s2043_s14  }
  0x9e   : > { %p2499_p13 = scmp.ne.s32.totalorder %s2484_s27, 0 }
  0x9f   : > { %p2500_p3 = scmp.eq.s32.totalorder (!%p2499_p13), %s2105_s24, 0 }
  0xa0   : > { %292 = sbr.rel (%p2499_p13) target bundleno = 1056 (0x420), region = 40 }
  0xa7   : > { %1991 = dma.done.wait (%p2500_p3), [#allocation5], 256   ;;  %p2501_p1 = pmov %p2500_p3 }
  0xa8   : > { %s298_s10 = sand.u32 1, %s2105_s24   ;;  %s300_s18 = sand.u32 1, %s2016_s19  }
  0xa9   : > { %1993 = vsyncadd (%p2501_p1), [#allocation5], 4294967040  ;;  %s1401_s29 = sshll.u32 %s300_s18, 9  ;;  %s299_s11 = scalar_lea.sflag [#allocation8], %s298_s10 }
  0xaa   : > { %s2303_s25 = scalar_lea.vmem [#allocation7], %s1401_s29  ;;  %p2502_p4 = scmp.ne.s32.totalorder %s2483_s26, 0 }
  0xac   : > { %1995 = dma.done.wait (%p2502_p4), %s299_s11, 8256  }
  0xad   : > { %1997 = vsyncadd (%p2502_p4), %s299_s11, 4294959040  ;;  %s1402_s27 = sshll.u32 %s300_s18, 2  ;;  %s1403_s7 = sshll.u32 %s300_s18, 8 }
  0xae   : > { %s2309_s6 = scalar_lea.vmem [#allocation9], %s1402_s27  ;;  %s317_s9 = scalar_lea.sflag [#allocation11], %s298_s10 }
  0xaf   : > { %s2311_s15 = scalar_lea.vmem [#allocation10], %s1403_s7 }
  0xb0   : > { %1999 = dma.done.wait (%p2502_p4), %s317_s9, 4096  }
  0xb1   : > { %2001 = vsyncadd (%p2502_p4), %s317_s9, 4294963200  ;;  %p2503_p9 = pmov %p2501_p1 }
  0xb2   : > { %p2504_p5 = pmov %p2501_p1 }
  0xb3   : > { %2003 = dma.done.wait (%p2503_p9), [#allocation11], 16  }
  0xb4   : > { %2005 = vsyncadd (%p2504_p5), [#allocation11], 4294967280  ;;  %p1405_p2 = scmp.ne.s32.totalorder %s2024_s21, 0 }
  0xb5   : > { %v364_v0 = vld [vmem:[#allocation4] sm:$0xff] (!%p1405_p2)  ;;  %v365_v1 = vld [vmem:[#allocation4 + $0x8] sm:$0xff] (!%p1405_p2)  ;;  %v2044_v5 = vmov (!%p1405_p2), 0.0  }
  0xb6   : > { %363 = sbr.rel (%p1405_p2) target bundleno = 346 (0x15a), region = 64  ;;  %v366_v2 = vmul.f32 (!%p1405_p2), %v364_v0, %v364_v0  ;;  %v367_v3 = vmul.f32 (!%p1405_p2), %v365_v1, %v365_v1  ;;  %384 = vst [vmem:[#allocation3] sm:$0xff] (!%p1405_p2), %v2044_v5 }
  0xb8   : > { %v368_v4 = vadd.f32 (!%p1405_p2), %v367_v3, %v366_v2 }
  0xba   : > { %369 = vadd.xlane.f32.xlu0 (!%p1405_p2), %v368_v4 }
 0x147   : > { %v370_v6 = vpop.xlane.xlu0 %369 }
 0x148   : > { %v371_v7 = vmax.f32 %v370_v6, 1e-24 }
 0x14a   : > { %1658 = vrsqrt.f32 %v371_v7 }
 0x154   : > { %v1659_v8 = vpop.eup %1658 }
 0x155   : > { %v373_v9 = vmul.f32 %v1659_v8, %v364_v0  ;;  %v374_v10 = vmul.f32 %v1659_v8, %v365_v1 }
 0x157   : > { %v1514_v11 = vpack.c.bf16 %v374_v10, %v373_v9 }
 0x159   : > { %383 = vst [vmem:[#allocation2] sm:$0xff] %v1514_v11 }
 0x15a PF: > { %v1660_v12 = vld [vmem:[%s2303_s25 + $0x4] ss:$16 sps:$4 sm:$0xff]   ;;  %v1662_v13 = vld [vmem:[%s2303_s25 + $0xc] ss:$16 sps:$4 sm:$0xff]   ;;  %v1664_v14 = vld [vmem:[%s2303_s25] ss:$16 sps:$4 sm:$0xff]  }
 0x15b   : > { %799 = vmatprep.subr.bf16.mxu0 %v1660_v12  ;;  %v1665_v15 = vld [vmem:[%s2303_s25 + $0x8] ss:$16 sps:$4 sm:$0xff]   ;;  %840 = vmatprep.subr.bf16.mxu1 %v1662_v13  ;;  %v1666_v16 = vld [vmem:[%s2303_s25 + $0x24] ss:$16 sps:$4 sm:$0xff]   ;;  %v1668_v17 = vld [vmem:[%s2303_s25 + $0x2c] ss:$16 sps:$4 sm:$0xff]  }
 0x15c   : > { %800 = vmatpush1.bf16.msra.mxu0 %v1664_v14  ;;  %841 = vmatpush1.bf16.msra.mxu1 %v1665_v15  ;;  %v1670_v18 = vld [vmem:[%s2303_s25 + $0x20] ss:$16 sps:$4 sm:$0xff]   ;;  %v1671_v19 = vld [vmem:[%s2303_s25 + $0x28] ss:$16 sps:$4 sm:$0xff]   ;;  %v1672_v20 = vld [vmem:[%s2303_s25 + $0x44] ss:$16 sps:$4 sm:$0xff]  }
 0x15d   : > { %801 = vmatprep.subr.bf16.mxu0 %v1666_v16  ;;  %842 = vmatprep.subr.bf16.mxu1 %v1668_v17  ;;  %v1674_v21 = vld [vmem:[%s2303_s25 + $0x4c] ss:$16 sps:$4 sm:$0xff]   ;;  %v1676_v22 = vld [vmem:[%s2303_s25 + $0x40] ss:$16 sps:$4 sm:$0xff]   ;;  %v1677_v23 = vld [vmem:[%s2303_s25 + $0x48] ss:$16 sps:$4 sm:$0xff]  }
 0x15e   : > { %v1678_v24 = vld [vmem:[%s2303_s25 + $0x64] ss:$16 sps:$4 sm:$0xff]   ;;  %v1680_v25 = vld [vmem:[%s2303_s25 + $0x6c] ss:$16 sps:$4 sm:$0xff]   ;;  %v1682_v26 = vld [vmem:[%s2303_s25 + $0x60] ss:$16 sps:$4 sm:$0xff]  }
 0x15f   : > { %v1683_v27 = vld [vmem:[%s2303_s25 + $0x68] ss:$16 sps:$4 sm:$0xff]   ;;  %v1684_v28 = vld [vmem:[%s2303_s25 + $0x84] ss:$16 sps:$4 sm:$0xff]   ;;  %v1686_v29 = vld [vmem:[%s2303_s25 + $0x8c] ss:$16 sps:$4 sm:$0xff]  }
 0x160   : > { %802 = vmatpush1.bf16.msra.mxu0 %v1670_v18  ;;  %843 = vmatpush1.bf16.msra.mxu1 %v1671_v19  ;;  %v1688_v30 = vld [vmem:[%s2303_s25 + $0x80] ss:$16 sps:$4 sm:$0xff]   ;;  %v1689_v31 = vld [vmem:[%s2303_s25 + $0x88] ss:$16 sps:$4 sm:$0xff]   ;;  %v1690_v32 = vld [vmem:[%s2303_s25 + $0xa4] ss:$16 sps:$4 sm:$0xff]  }
 0x161   : > { %803 = vmatprep.subr.bf16.mxu0 %v1672_v20  ;;  %844 = vmatprep.subr.bf16.mxu1 %v1674_v21  ;;  %v1692_v33 = vld [vmem:[%s2303_s25 + $0xac] ss:$16 sps:$4 sm:$0xff]   ;;  %v1694_v34 = vld [vmem:[%s2303_s25 + $0xa0] ss:$16 sps:$4 sm:$0xff]   ;;  %v1695_v35 = vld [vmem:[%s2303_s25 + $0xa8] ss:$16 sps:$4 sm:$0xff]  }
 0x162   : > { %v1696_v36 = vld [vmem:[%s2303_s25 + $0xc4] ss:$16 sps:$4 sm:$0xff]   ;;  %v1698_v37 = vld [vmem:[%s2303_s25 + $0xcc] ss:$16 sps:$4 sm:$0xff]   ;;  %v1700_v38 = vld [vmem:[%s2303_s25 + $0xc0] ss:$16 sps:$4 sm:$0xff]  }
 0x163   : > { %v1701_v39 = vld [vmem:[%s2303_s25 + $0xc8] ss:$16 sps:$4 sm:$0xff]   ;;  %v1702_v40 = vld [vmem:[%s2303_s25 + $0xe4] ss:$16 sps:$4 sm:$0xff]   ;;  %v1704_v41 = vld [vmem:[%s2303_s25 + $0xec] ss:$16 sps:$4 sm:$0xff]  }
 0x164   : > { %804 = vmatpush1.bf16.msra.mxu0 %v1676_v22  ;;  %845 = vmatpush1.bf16.msra.mxu1 %v1677_v23  ;;  %v1706_v42 = vld [vmem:[%s2303_s25 + $0xe0] ss:$16 sps:$4 sm:$0xff]   ;;  %v1707_v43 = vld [vmem:[%s2303_s25 + $0xe8] ss:$16 sps:$4 sm:$0xff]   ;;  %v1708_v44 = vld [vmem:[%s2303_s25 + $0x104] ss:$16 sps:$4 sm:$0xff]  }
 0x165   : > { %805 = vmatprep.subr.bf16.mxu0 %v1678_v24  ;;  %846 = vmatprep.subr.bf16.mxu1 %v1680_v25  ;;  %v1710_v45 = vld [vmem:[%s2303_s25 + $0x10c] ss:$16 sps:$4 sm:$0xff]   ;;  %v1712_v46 = vld [vmem:[%s2303_s25 + $0x100] ss:$16 sps:$4 sm:$0xff]   ;;  %v1713_v47 = vld [vmem:[%s2303_s25 + $0x108] ss:$16 sps:$4 sm:$0xff]  }
 0x166   : > { %v1714_v48 = vld [vmem:[%s2303_s25 + $0x124] ss:$16 sps:$4 sm:$0xff]   ;;  %v1716_v49 = vld [vmem:[%s2303_s25 + $0x12c] ss:$16 sps:$4 sm:$0xff]   ;;  %v1718_v50 = vld [vmem:[%s2303_s25 + $0x120] ss:$16 sps:$4 sm:$0xff]  }
 0x167   : > { %v1719_v51 = vld [vmem:[%s2303_s25 + $0x128] ss:$16 sps:$4 sm:$0xff]   ;;  %v1720_v52 = vld [vmem:[%s2303_s25 + $0x144] ss:$16 sps:$4 sm:$0xff]   ;;  %v1722_v53 = vld [vmem:[%s2303_s25 + $0x14c] ss:$16 sps:$4 sm:$0xff]  }
 0x168   : > { %806 = vmatpush1.bf16.msra.mxu0 %v1682_v26  ;;  %847 = vmatpush1.bf16.msra.mxu1 %v1683_v27  ;;  %v1724_v54 = vld [vmem:[%s2303_s25 + $0x140] ss:$16 sps:$4 sm:$0xff]   ;;  %v1725_v55 = vld [vmem:[%s2303_s25 + $0x148] ss:$16 sps:$4 sm:$0xff]   ;;  %v1726_v56 = vld [vmem:[%s2303_s25 + $0x164] ss:$16 sps:$4 sm:$0xff]  }
 0x169   : > { %807 = vmatprep.subr.bf16.mxu0 %v1684_v28  ;;  %848 = vmatprep.subr.bf16.mxu1 %v1686_v29  ;;  %v1728_v57 = vld [vmem:[%s2303_s25 + $0x16c] ss:$16 sps:$4 sm:$0xff]   ;;  %v1730_v58 = vld [vmem:[%s2303_s25 + $0x160] ss:$16 sps:$4 sm:$0xff]   ;;  %v1731_v60 = vld [vmem:[%s2303_s25 + $0x168] ss:$16 sps:$4 sm:$0xff]  }
 0x16a   : > { %v385_v59 = vld [vmem:[#allocation2] sm:$0xff]  ;;  %v1734_v63 = vld [vmem:[%s2303_s25 + $0x18c] ss:$16 sps:$4 sm:$0xff]   ;;  %v1737_v1 = vld [vmem:[%s2303_s25 + $0x188] ss:$16 sps:$4 sm:$0xff]   ;;  %p1505_p12 = scmp.ne.s32.totalorder %s2024_s21, 7 }
 0x16b   : > { %v1408_v61 = vcombine.high %v385_v59, %v385_v59  ;;  %v1732_v62 = vld [vmem:[%s2303_s25 + $0x184] ss:$16 sps:$4 sm:$0xff]   ;;  %v1736_v0 = vld [vmem:[%s2303_s25 + $0x180] ss:$16 sps:$4 sm:$0xff]   ;;  %v1740_v3 = vld [vmem:[%s2303_s25 + $0x1ac] ss:$16 sps:$4 sm:$0xff]   ;;  %v1407_v17 = vcombine.low %v385_v59, %v385_v59 }
 0x16c   : > { %808 = vmatpush1.bf16.msra.mxu0 %v1688_v30  ;;  %849 = vmatpush1.bf16.msra.mxu1 %v1689_v31  ;;  %v1738_v2 = vld [vmem:[%s2303_s25 + $0x1a4] ss:$16 sps:$4 sm:$0xff]   ;;  %v1742_v4 = vld [vmem:[%s2303_s25 + $0x1a0] ss:$16 sps:$4 sm:$0xff]   ;;  %v1743_v5 = vld [vmem:[%s2303_s25 + $0x1a8] ss:$16 sps:$4 sm:$0xff]  }
 0x16d   : > { %809 = vmatprep.subr.bf16.mxu0 %v1690_v32  ;;  %850 = vmatprep.subr.bf16.mxu1 %v1692_v33  ;;  %v1744_v6 = vld [vmem:[%s2303_s25 + $0x1c4] ss:$16 sps:$4 sm:$0xff]   ;;  %v1746_v7 = vld [vmem:[%s2303_s25 + $0x1cc] ss:$16 sps:$4 sm:$0xff]   ;;  %v1748_v8 = vld [vmem:[%s2303_s25 + $0x1c0] ss:$16 sps:$4 sm:$0xff]  }
 0x16e   : > { %831 = vmatprep.mubr.bf16.mxu0 %v1408_v61  ;;  %872 = vmatprep.mubr.bf16.mxu1 %v1408_v61  ;;  %v1749_v9 = vld [vmem:[%s2303_s25 + $0x1c8] ss:$16 sps:$4 sm:$0xff]   ;;  %v1750_v10 = vld [vmem:[%s2303_s25 + $0x1e4] ss:$16 sps:$4 sm:$0xff]   ;;  %v1752_v11 = vld [vmem:[%s2303_s25 + $0x1ec] ss:$16 sps:$4 sm:$0xff]  }
 0x16f   : > { %v1754_v12 = vld [vmem:[%s2303_s25 + $0x1e0] ss:$16 sps:$4 sm:$0xff]   ;;  %v1755_v13 = vld [vmem:[%s2303_s25 + $0x1e8] ss:$16 sps:$4 sm:$0xff]  }
 0x170   : > { %810 = vmatpush1.bf16.msra.mxu0 %v1694_v34  ;;  %851 = vmatpush1.bf16.msra.mxu1 %v1695_v35  ;;  %v1758_v14 = vld [vmem:[%s2311_s15 + $0x40] sm:$0xff]   ;;  %v1762_v19 = vld [vmem:[%s2311_s15 + $0x48] sm:$0xff]   ;;  %v1766_v23 = vld [vmem:[%s2311_s15 + $0x50] sm:$0xff]  }
 0x171   : > { %811 = vmatprep.subr.bf16.mxu0 %v1696_v36  ;;  %852 = vmatprep.subr.bf16.mxu1 %v1698_v37  ;;  %v1759_v15 = vld [vmem:[%s2311_s15 + $0xc0] sm:$0xff]   ;;  %v1763_v20 = vld [vmem:[%s2311_s15 + $0xc8] sm:$0xff]   ;;  %v1767_v24 = vld [vmem:[%s2311_s15 + $0xd0] sm:$0xff]  }
 0x172   : > { %v1760_v16 = vld [vmem:[%s2311_s15] sm:$0xff]   ;;  %v1764_v21 = vld [vmem:[%s2311_s15 + $0x8] sm:$0xff]   ;;  %v1768_v25 = vld [vmem:[%s2311_s15 + $0x10] sm:$0xff]  }
 0x173   : > { %v1761_v18 = vld [vmem:[%s2311_s15 + $0x80] sm:$0xff]   ;;  %v1765_v22 = vld [vmem:[%s2311_s15 + $0x88] sm:$0xff]   ;;  %v1769_v26 = vld [vmem:[%s2311_s15 + $0x90] sm:$0xff]  }
 0x174   : > { %812 = vmatpush1.bf16.msra.mxu0 %v1700_v38  ;;  %853 = vmatpush1.bf16.msra.mxu1 %v1701_v39  ;;  %v1770_v27 = vld [vmem:[%s2311_s15 + $0x58] sm:$0xff]   ;;  %v1774_v31 = vld [vmem:[%s2311_s15 + $0x60] sm:$0xff]   ;;  %v1778_v35 = vld [vmem:[%s2311_s15 + $0x68] sm:$0xff]  }
 0x175   : > { %813 = vmatprep.subr.bf16.mxu0 %v1702_v40  ;;  %854 = vmatprep.subr.bf16.mxu1 %v1704_v41  ;;  %v1771_v28 = vld [vmem:[%s2311_s15 + $0xd8] sm:$0xff]   ;;  %v1775_v32 = vld [vmem:[%s2311_s15 + $0xe0] sm:$0xff]   ;;  %v1779_v36 = vld [vmem:[%s2311_s15 + $0xe8] sm:$0xff]  }
 0x176   : > { %v1772_v29 = vld [vmem:[%s2311_s15 + $0x18] sm:$0xff]   ;;  %v1776_v33 = vld [vmem:[%s2311_s15 + $0x20] sm:$0xff]   ;;  %v1780_v37 = vld [vmem:[%s2311_s15 + $0x28] sm:$0xff]  }
 0x177   : > { %v1773_v30 = vld [vmem:[%s2311_s15 + $0x98] sm:$0xff]   ;;  %v1777_v34 = vld [vmem:[%s2311_s15 + $0xa0] sm:$0xff]   ;;  %v1781_v38 = vld [vmem:[%s2311_s15 + $0xa8] sm:$0xff]  }
 0x178   : > { %814 = vmatpush1.bf16.msra.mxu0 %v1706_v42  ;;  %855 = vmatpush1.bf16.msra.mxu1 %v1707_v43  ;;  %v1782_v39 = vld [vmem:[%s2311_s15 + $0x70] sm:$0xff]   ;;  %v1786_v43 = vld [vmem:[%s2311_s15 + $0x78] sm:$0xff]  }
 0x179   : > { %815 = vmatprep.subr.bf16.mxu0 %v1708_v44  ;;  %856 = vmatprep.subr.bf16.mxu1 %v1710_v45  ;;  %v1783_v40 = vld [vmem:[%s2311_s15 + $0xf0] sm:$0xff]   ;;  %v1787_v44 = vld [vmem:[%s2311_s15 + $0xf8] sm:$0xff]  }
 0x17a   : > { %v1784_v41 = vld [vmem:[%s2311_s15 + $0x30] sm:$0xff]   ;;  %v1788_v45 = vld [vmem:[%s2311_s15 + $0x38] sm:$0xff]  }
 0x17b   : > { %v1785_v42 = vld [vmem:[%s2311_s15 + $0xb0] sm:$0xff]  }
 0x17c   : > { %816 = vmatpush1.bf16.msra.mxu0 %v1712_v46  ;;  %857 = vmatpush1.bf16.msra.mxu1 %v1713_v47  ;;  %v1789_v46 = vld [vmem:[%s2311_s15 + $0xb8] sm:$0xff]   ;;  %v452_v47 = vlaneseq }
 0x17d   : > { %817 = vmatprep.subr.bf16.mxu0 %v1714_v48  ;;  %858 = vmatprep.subr.bf16.mxu1 %v1716_v49 }
 0x17e   : > { %v453_v48 = vshrl.u32 %v452_v47, 7 }
 0x180   : > { %818 = vmatpush1.bf16.msra.mxu0 %v1718_v50  ;;  %859 = vmatpush1.bf16.msra.mxu1 %v1719_v51  ;;  %v454_v49 = vsub.s32 0, %v453_v48  ;;  %v462_v50 = vsub.s32 2, %v453_v48  ;;  %v450_v51 = vld [vmem:[%s2309_s6] sm:$0xf] }
 0x181   : > { %819 = vmatprep.subr.bf16.mxu0 %v1720_v52  ;;  %860 = vmatprep.subr.bf16.mxu1 %v1722_v53  ;;  %v458_v52 = vsub.s32 1, %v453_v48  ;;  %v466_v53 = vsub.s32 3, %v453_v48 }
 0x184   : > { %820 = vmatpush1.bf16.msra.mxu0 %v1724_v54  ;;  %861 = vmatpush1.bf16.msra.mxu1 %v1725_v55  ;;  %v455_v54 = vrot.slane %v450_v51, %v454_v49  ;;  %v463_v55 = vrot.slane %v450_v51, %v462_v50 }
 0x185   : > { %821 = vmatprep.subr.bf16.mxu0 %v1726_v56  ;;  %862 = vmatprep.subr.bf16.mxu1 %v1728_v57  ;;  %v459_v56 = vrot.slane %v450_v51, %v458_v52  ;;  %v467_v57 = vrot.slane %v450_v51, %v466_v53 }
 0x188   : > { %822 = vmatpush1.bf16.msra.mxu0 %v1730_v58  ;;  %863 = vmatpush1.bf16.msra.mxu1 %v1731_v60 }
 0x189   : > { %823 = vmatprep.subr.bf16.mxu0 %v1732_v62  ;;  %864 = vmatprep.subr.bf16.mxu1 %v1734_v63 }
 0x18c   : > { %824 = vmatpush1.bf16.msra.mxu0 %v1736_v0  ;;  %865 = vmatpush1.bf16.msra.mxu1 %v1737_v1 }
 0x18d   : > { %825 = vmatprep.subr.bf16.mxu0 %v1738_v2  ;;  %866 = vmatprep.subr.bf16.mxu1 %v1740_v3 }
 0x190   : > { %826 = vmatpush1.bf16.msra.mxu0 %v1742_v4  ;;  %867 = vmatpush1.bf16.msra.mxu1 %v1743_v5 }
 0x191   : > { %827 = vmatprep.subr.bf16.mxu0 %v1744_v6  ;;  %868 = vmatprep.subr.bf16.mxu1 %v1746_v7 }
 0x194   : > { %828 = vmatpush1.bf16.msra.mxu0 %v1748_v8  ;;  %869 = vmatpush1.bf16.msra.mxu1 %v1749_v9 }
 0x195   : > { %829 = vmatprep.subr.bf16.mxu0 %v1750_v10  ;;  %870 = vmatprep.subr.bf16.mxu1 %v1752_v11 }
 0x198   : > { %830 = vmatpush1.bf16.msra.mxu0 %v1754_v12  ;;  %871 = vmatpush1.bf16.msra.mxu1 %v1755_v13 }
 0x199   : > { %1515 = vmatprep.subr.bf16.mxu0 %v1758_v14  ;;  %1537 = vmatprep.subr.bf16.mxu1 %v1759_v15 }
 0x19b   : > { %832 = vmatmul.mubr.bf16.vlgmr.msra.gmra.mrb[0].mxu0 %v1407_v17  ;;  %873 = vmatmul.mubr.bf16.vlgmr.msra.gmra.mrb[0].mxu1 %v1407_v17 }
 0x19c   : > { %1516 = vmatpush3.bf16.msra.mxu0 %v1760_v16  ;;  %1538 = vmatpush3.bf16.msra.mxu1 %v1761_v18 }
 0x19d   : > { %1517 = vmatprep.subr.bf16.mxu0 %v1762_v19  ;;  %1539 = vmatprep.subr.bf16.mxu1 %v1763_v20 }
 0x1a0   : > { %1518 = vmatpush3.bf16.msra.mxu0 %v1764_v21  ;;  %1540 = vmatpush3.bf16.msra.mxu1 %v1765_v22  ;;  %v885_v22 = vld [vmem:[#allocation3] sm:$0xff] }
 0x1a1   : > { %1519 = vmatprep.subr.bf16.mxu0 %v1766_v23  ;;  %1541 = vmatprep.subr.bf16.mxu1 %v1767_v24 }
 0x1a4   : > { %1520 = vmatpush3.bf16.msra.mxu0 %v1768_v25  ;;  %1542 = vmatpush3.bf16.msra.mxu1 %v1769_v26 }
 0x1a5   : > { %1521 = vmatprep.subr.bf16.mxu0 %v1770_v27  ;;  %1543 = vmatprep.subr.bf16.mxu1 %v1771_v28  ;;  %v1506_v28 = vld [vmem:[#allocation12] ss:$0 sm:$0xff] (!%p1505_p12) }
 0x1a8   : > { %1522 = vmatpush3.bf16.msra.mxu0 %v1772_v29  ;;  %1544 = vmatpush3.bf16.msra.mxu1 %v1773_v30 }
 0x1a9   : > { %1523 = vmatprep.subr.bf16.mxu0 %v1774_v31  ;;  %1545 = vmatprep.subr.bf16.mxu1 %v1775_v32 }
 0x1ac   : > { %1524 = vmatpush3.bf16.msra.mxu0 %v1776_v33  ;;  %1546 = vmatpush3.bf16.msra.mxu1 %v1777_v34 }
 0x1ad   : > { %1525 = vmatprep.subr.bf16.mxu0 %v1778_v35  ;;  %1547 = vmatprep.subr.bf16.mxu1 %v1779_v36 }
 0x1b0   : > { %1526 = vmatpush3.bf16.msra.mxu0 %v1780_v37  ;;  %1548 = vmatpush3.bf16.msra.mxu1 %v1781_v38 }
 0x1b1   : > { %1527 = vmatprep.subr.bf16.mxu0 %v1782_v39  ;;  %1549 = vmatprep.subr.bf16.mxu1 %v1783_v40 }
 0x1b4   : > { %1528 = vmatpush3.bf16.msra.mxu0 %v1784_v41  ;;  %1550 = vmatpush3.bf16.msra.mxu1 %v1785_v42 }
 0x1b5   : > { %1529 = vmatprep.subr.bf16.mxu0 %v1786_v43  ;;  %1551 = vmatprep.subr.bf16.mxu1 %v1787_v44 }
 0x1b8   : > { %1530 = vmatpush3.bf16.msra.mxu0 %v1788_v45  ;;  %1552 = vmatpush3.bf16.msra.mxu1 %v1789_v46 }
 0x26e   : > { %v833_v58 = vpop.f32.mrb[0].mxu0  ;;  %v874_v59 = vpop.f32.mrb[0].mxu1 }
 0x26f   : > { %v834_v60 = vadd.f32 %v833_v58, %v455_v54  ;;  %v875_v61 = vadd.f32 %v874_v59, %v463_v55  ;;  %v835_v62 = vpop.f32.mrb[1].mxu0  ;;  %v876_v63 = vpop.f32.mrb[1].mxu1 }
 0x270   : > { %v836_v0 = vadd.f32 %v835_v62, %v459_v56  ;;  %v877_v1 = vadd.f32 %v876_v63, %v467_v57  ;;  %v837_v2 = vpop.f32.mrb[2].mxu0  ;;  %v878_v3 = vpop.f32.mrb[2].mxu1 }
 0x271   : > { %v881_v4 = vmax.f32 %v834_v60, 0.0  ;;  %v883_v5 = vmax.f32 %v875_v61, 0.0  ;;  %v838_v6 = vpop.f32.mrb[3].mxu0  ;;  %v879_v7 = vpop.f32.mrb[3].mxu1 }
 0x272   : > { %v882_v8 = vmax.f32 %v836_v0, 0.0  ;;  %v884_v9 = vmax.f32 %v877_v1, 0.0 }
 0x273   : > { %v886_v12 = vpack.c.bf16 %v881_v4, %v881_v4  ;;  %v888_v13 = vpack.c.bf16 %v883_v5, %v883_v5 }
 0x274   : > { %v887_v10 = vpack.c.bf16 %v882_v8, %v882_v8  ;;  %v889_v11 = vpack.c.bf16 %v884_v9, %v884_v9 }
 0x276   : > { %1178 = vmatprep.mubr.bf16.mxu0 %v887_v10  ;;  %1218 = vmatprep.mubr.bf16.mxu1 %v889_v11 }
 0x277   : > { %1179 = vmatmul.mubr.bf16.vlgmr.msra.gmra.mrb[4].mxu0 %v886_v12  ;;  %1219 = vmatmul.mubr.bf16.vlgmr.msra.gmra.mrb[4].mxu1 %v888_v13 }
 0x34a   : > { %v1531_v14 = vpop.f32.mrb[4].mxu0  ;;  %v1553_v15 = vpop.f32.mrb[4].mxu1 }
 0x34b   : > { %v1532_v16 = vpop.f32.mrb[5].mxu0  ;;  %v1554_v17 = vpop.f32.mrb[5].mxu1 }
 0x34c   : > { %v1533_v18 = vadd.f32 %v1532_v16, %v1531_v14  ;;  %v1555_v19 = vadd.f32 %v1554_v17, %v1553_v15  ;;  %v1534_v20 = vpop.f32.mrb[6].mxu0  ;;  %v1556_v21 = vpop.f32.mrb[6].mxu1  ;;  %1231 = sbr.rel (%p1505_p12) target bundleno = 1031 (0x407), region = 68 }
 0x34d   : > { %v1535_v23 = vpop.f32.mrb[7].mxu0  ;;  %v1557_v24 = vpop.f32.mrb[7].mxu1 }
 0x34e   : > { %v1221_v25 = vadd.f32 %v1555_v19, %v1533_v18 }
 0x350   : > { %v1226_v26 = vadd.f32 %v1221_v25, %v885_v22 }
 0x352   : > { %1227 = vst [vmem:[#allocation3] sm:$0xff] %v1226_v26 }
 0x359   : > { %v1232_v27 = vld [vmem:[#allocation3] sm:$0xff] }
 0x35a   : > { %v1240_v29 = vadd.f32 %v1506_v28, %v1232_v27 }
 0x35c   : > { %1790 = vtanh.f32 %v1240_v29 }
 0x366   : > { %v1791_v30 = vpop.eup %1790 }
 0x367   : > { %v1242_v31 = vmul.f32 %v1791_v30, %v1791_v30 }
 0x369   : > { %1243 = vadd.xlane.f32.xlu0 %v1242_v31 }
 0x3f6   : > { %v1244_v32 = vpop.xlane.xlu0 %1243 }
 0x3f7   : > { %v1245_v33 = vmax.f32 %v1244_v32, 1e-24 }
 0x3f9   : > { %1792 = vrsqrt.f32 %v1245_v33 }
 0x403   : > { %v1793_v34 = vpop.eup %1792 }
 0x404   : > { %v1247_v35 = vmul.f32 %v1793_v34, %v1791_v30 }
 0x406   : > { %1248 = vst [vmem:[#allocation13] sm:$0xff] %v1247_v35 }
 0x407 PF: > { %p1599_p11 = scmp.eq.s32.totalorder %s2105_s24, 7  ;;  %s2045_s26 = smov [#allocation13]  }
 0x408   : > { %s1258_s21 = sshll.u32 %s2045_s26, 4  ;;  %s1259_s21 = int_to_ptr.vmem [resolvable:$true] %s1258_s21 }
 0x409   : > { %s1940_s8 = scalar_lea.vmem %s1259_s21, 128  ;;  %p1947_p6 = scmp.lt.s32.totalorder %s1259_s21, %s1259_s21 }
 0x40a   : > { %p1941_p0 = scmp.ne.s32.totalorder %s1259_s21, %s1940_s8  ;;  %p1948_p8 = scmp.lt.s32.totalorder %s1940_s8, %s1940_s8 }
 0x40c   : > { %p1942_p7 = pnand %p1941_p0, %p1599_p11  ;;  %p1949_p13 = por %p1948_p8, %p1947_p6 }
 0x40e   : > { %p1943_p10 = pneg %p1942_p7 }
 0x410   : > { %p1950_p3 = pnand %p1949_p13, %p1943_p10 }
 0x412   : > { %1953 = shalt.err (!%p1950_p3)
}
 0x413   : > { %s1954_s12 = scalar_lea.hbm %s2466_s5, 128 }
 0x414   : > { %p1955_p1 = scmp.ne.s32.totalorder %s2466_s5, %s1954_s12  ;;  %p1960_p5 = scmp.lt.u32.totalorder %s1954_s12, %s2466_s5 }
 0x416   : > { %p1956_p4 = pnand %p1955_p1, %p1599_p11 }
 0x418   : > { %p1957_p9 = pneg %p1956_p4 }
 0x41a   : > { %p1962_p2 = pnand %p1960_p5, %p1957_p9 }
 0x41c   : > { %1965 = shalt.err (!%p1962_p2)
}
 0x41d   : > { %1574 = dma.vmem_to_hbm [thread:$0]  (%p1599_p11), %s1259_s21, 128, %s2466_s5, [#allocation6]  }
 0x41e   : > { %2007 = dma.done.wait (%p1599_p11), [#allocation6], 128  }
 0x41f   : > { %2009 = vsyncadd (%p1599_p11), [#allocation6], 4294967168 }
 0x420 PF: > { %s23_s23 = sadd.s32 1, %s2032_s23   ;;  %s2505_s14 = sld [smem:[#allocation19_spill]] }
 0x421   : > { %p20_p12 = scmp.ge.s32.totalorder %s23_s23, 10   ;;  %s2506_s20 = sld [smem:[#allocation21_spill]] }
 0x422   : > { %s2507_s10 = sld [smem:[#allocation20_spill]]  ;;  %s2508_s18 = smov %s2016_s19 }
 0x423   : > { %s2510_s21 = smov %s2028_s22  ;;  %22 = sbr.rel (!%p20_p12) target bundleno = 11 (0xb), region = 120 }
 0x426   : > { %s2509_s19 = smov %s2505_s14 }
 0x428   : > { %s2511_s22 = smov %s2507_s10 }
 0x42a   :  { %1271 = vsyncpa [#allocation5], 1 }
 0x42b   :  { %1273 = vsyncpa [#allocation5 + $0x1], 1 }
 0x42c   :  { %1274 = vsyncpa [#allocation8], 1 }
 0x42d   :  { %1276 = vsyncpa [#allocation8 + $0x1], 1 }
 0x42e   :  { %1277 = vsyncpa [#allocation11], 1 }
 0x42f   :  { %1279 = vsyncpa [#allocation11 + $0x1], 1 }
 0x430   :  { %1280 = vsyncpa [#allocation6], 1 }
 0x431   :  { %1282 = vsyncpa [#allocation6 + $0x1], 1 }

</bundles_post_ra>
